<compile_context>
chip_gen: v6e
topology: v6e:2x2x1
jax: 0.10.0
libtpu: 0.0.40
codegen_flags: <defaults>
</compile_context>

<pallas_src>
import functools
import math

import jax
import jax.numpy as jnp
from jax.experimental import pallas as pl
from jax.experimental.pallas import tpu as pltpu

BN_EPS = 1e-3

# EfficientNet-B3 block configuration (width 1.2 / depth 1.4 already applied):
#   (kernel, stride, expand_ratio, in_ch, out_ch, repeats)
STAGES = [
    (3, 1, 1, 40, 24, 2),
    (3, 2, 6, 24, 32, 3),
    (5, 2, 6, 32, 48, 3),
    (3, 2, 6, 48, 96, 5),
    (5, 1, 6, 96, 136, 5),
    (5, 2, 6, 136, 232, 6),
    (3, 1, 6, 232, 384, 2),
]
STEM_OUT = 40
HEAD_OUT = 1536
SE_RATIO = 0.25

LANES = 128
TILE_M = 1024                # row tile for 1x1-conv matmuls
TILE_HW = 1024               # per-image spatial tile (project / SE pooling)
VMEM_LIMIT = 64 * 1024 * 1024  # explicit scoped-VMEM budget


# ----------------------------- Pallas kernels ------------------------------

def _sigmoid(x):
    # reciprocal on the EUP (approx) keeps the swish/BN epilogue off the VALU.
    return pl.reciprocal(1.0 + jnp.exp(-x), approx=True)


def _mm_bn_act_kernel(act, x_ref, w_ref, s_ref, b_ref, o_ref):
    # y = act((x @ w) * scale + bias); bf16 in, f32 accumulate, bf16 out.
    y = jnp.dot(x_ref[...], w_ref[...], preferred_element_type=jnp.float32)
    y = y * s_ref[...] + b_ref[...]
    if act == "swish":
        y = y * _sigmoid(y)
    o_ref[...] = y.astype(o_ref.dtype)


def _proj_bn_kernel(has_res, x_ref, g_ref, w_ref, s_ref, b_ref, *rest):
    # project 1x1 conv with the SE gate folded in: ((x * gate) @ w) * s + b [+ res]
    if has_res:
        r_ref, o_ref = rest
    else:
        (o_ref,) = rest
        r_ref = None
    xg = (x_ref[...].astype(jnp.float32) * g_ref[...]).astype(jnp.bfloat16)
    y = jnp.dot(xg, w_ref[...], preferred_element_type=jnp.float32)
    y = y * s_ref[...] + b_ref[...]
    if has_res:
        y = y + r_ref[...].astype(jnp.float32)
    o_ref[...] = y.astype(o_ref.dtype)


def _dw_bn_swish_kernel(k, x_ref, w_ref, s_ref, b_ref, o_ref):
    # depthwise conv as k*k shifted-window multiply-adds on the padded input
    # (window extraction fused in-kernel: no HBM im2col), then BN + swish.
    oh, ow, c = o_ref.shape
    acc = None
    for ki in range(k):
        for kj in range(k):
            win = x_ref[ki:ki + oh, kj:kj + ow, :].astype(jnp.float32)
            term = win * w_ref[ki * k + kj:ki * k + kj + 1, :]
            acc = term if acc is None else acc + term
    y = acc * s_ref[...] + b_ref[...]
    o_ref[...] = (y * _sigmoid(y)).astype(o_ref.dtype)


def _pool_gate_kernel(total_rows, x_ref, w1_ref, b1_ref, w2_ref, b2_ref,
                      g_ref, acc_ref):
    # Fused squeeze-excite: tiled mean over HW (f32 scratch accumulator) and,
    # on the last HW tile, the FC -> swish -> FC -> sigmoid gate.
    ti = pl.program_id(1)

    @pl.when(ti == 0)
    def _():
        acc_ref[...] = jnp.zeros_like(acc_ref)

    thw = x_ref.shape[0]
    row = jax.lax.broadcasted_iota(jnp.int32, (thw, 1), 0) + ti * thw
    x = jnp.where(row < total_rows, x_ref[...].astype(jnp.float32), 0.0)
    acc_ref[...] += jnp.sum(x, axis=0, keepdims=True) * (1.0 / total_rows)

    @pl.when(ti == pl.num_programs(1) - 1)
    def _():
        p = acc_ref[...]
        s = jnp.dot(p, w1_ref[...], preferred_element_type=jnp.float32) + b1_ref[...]
        s = s * _sigmoid(s)
        g = jnp.dot(s, w2_ref[...], preferred_element_type=jnp.float32) + b2_ref[...]
        g_ref[...] = _sigmoid(g)


def _pool_fc_kernel(total_rows, x_ref, w_ref, b_ref, o_ref, acc_ref):
    # Fused global-average-pool + final Linear (lane-padded 128-wide output).
    ti = pl.program_id(1)

    @pl.when(ti == 0)
    def _():
        acc_ref[...] = jnp.zeros_like(acc_ref)

    thw = x_ref.shape[0]
    row = jax.lax.broadcasted_iota(jnp.int32, (thw, 1), 0) + ti * thw
    x = jnp.where(row < total_rows, x_ref[...].astype(jnp.float32), 0.0)
    acc_ref[...] += jnp.sum(x, axis=0, keepdims=True) * (1.0 / total_rows)

    @pl.when(ti == pl.num_programs(1) - 1)
    def _():
        o_ref[...] = jnp.dot(acc_ref[...], w_ref[...],
                             preferred_element_type=jnp.float32) + b_ref[...]


# ------------------------------ kernel wrappers -----------------------------

def _compiler_params(semantics=None):
    return pltpu.CompilerParams(dimension_semantics=semantics,
                                vmem_limit_bytes=VMEM_LIMIT)


def mm_bn_act(x, w, scale, bias, act="swish", out_dtype=jnp.bfloat16):
    """(M, Cin) @ (Cin, Cout) with folded BN + optional swish, tiled over rows."""
    m, cin = x.shape
    cout = w.shape[1]
    tm = m if m <= TILE_M else TILE_M
    return pl.pallas_call(
        functools.partial(_mm_bn_act_kernel, act),
        out_shape=jax.ShapeDtypeStruct((m, cout), out_dtype),
        grid=(pl.cdiv(m, tm),),
        in_specs=[
            pl.BlockSpec((tm, cin), lambda i: (i, 0)),
            pl.BlockSpec((cin, cout), lambda i: (0, 0)),
            pl.BlockSpec((1, cout), lambda i: (0, 0)),
            pl.BlockSpec((1, cout), lambda i: (0, 0)),
        ],
        out_specs=pl.BlockSpec((tm, cout), lambda i: (i, 0)),
        compiler_params=_compiler_params(("parallel",)),
    )(x, w, scale.reshape(1, cout), bias.reshape(1, cout))


def project_bn_gate(x, gate, w, scale, bias, residual=None):
    """Project 1x1 conv + BN with the SE gate folded in; optional fused residual.

    x: (N, HW, Cexp) bf16, gate: (N, Cexp) f32, residual: (N, HW, Cout) bf16.
    """
    n, hw, cexp = x.shape
    cout = w.shape[1]
    thw = hw if hw <= TILE_HW else TILE_HW
    in_specs = [
        pl.BlockSpec((None, thw, cexp), lambda ni, ti: (ni, ti, 0)),
        pl.BlockSpec((1, cexp), lambda ni, ti: (ni, 0)),
        pl.BlockSpec((cexp, cout), lambda ni, ti: (0, 0)),
        pl.BlockSpec((1, cout), lambda ni, ti: (0, 0)),
        pl.BlockSpec((1, cout), lambda ni, ti: (0, 0)),
    ]
    args = [x, gate, w, scale.reshape(1, cout), bias.reshape(1, cout)]
    if residual is not None:
        in_specs.append(pl.BlockSpec((None, thw, cout), lambda ni, ti: (ni, ti, 0)))
        args.append(residual)
    return pl.pallas_call(
        functools.partial(_proj_bn_kernel, residual is not None),
        out_shape=jax.ShapeDtypeStruct((n, hw, cout), jnp.bfloat16),
        grid=(n, pl.cdiv(hw, thw)),
        in_specs=in_specs,
        out_specs=pl.BlockSpec((None, thw, cout), lambda ni, ti: (ni, ti, 0)),
        compiler_params=_compiler_params(("parallel", "parallel")),
    )(*args)


def depthwise_bn_swish(x, w, scale, bias, k, s):
    """Fused depthwise conv (TF-SAME padding) + BN + swish, gridded (N, C-tiles).

    The kernel computes the stride-1 output from the padded input; for
    stride-2 layers (4 of 26 blocks) the wrapper subsamples afterwards, which
    is far cheaper than a k^2 HBM im2col blow-up.
    """
    n, h, wd, c = x.shape
    oh = -(-h // s)
    ow = -(-wd // s)
    ph = max((oh - 1) * s + k - h, 0)
    pw = max((ow - 1) * s + k - wd, 0)
    xp = jnp.pad(x, ((0, 0), (ph // 2, ph - ph // 2), (pw // 2, pw - pw // 2), (0, 0)))
    hp, wp = xp.shape[1], xp.shape[2]
    oh1, ow1 = hp - k + 1, wp - k + 1

    tc = c if c <= LANES else LANES
    out1 = pl.pallas_call(
        functools.partial(_dw_bn_swish_kernel, k),
        out_shape=jax.ShapeDtypeStruct((n, oh1, ow1, c), jnp.bfloat16),
        grid=(n, pl.cdiv(c, tc)),
        in_specs=[
            pl.BlockSpec((None, hp, wp, tc), lambda ni, ci: (ni, 0, 0, ci)),
            pl.BlockSpec((k * k, tc), lambda ni, ci: (0, ci)),
            pl.BlockSpec((1, tc), lambda ni, ci: (0, ci)),
            pl.BlockSpec((1, tc), lambda ni, ci: (0, ci)),
        ],
        out_specs=pl.BlockSpec((None, oh1, ow1, tc), lambda ni, ci: (ni, 0, 0, ci)),
        compiler_params=_compiler_params(("parallel", "parallel")),
    )(xp, w, scale.reshape(1, c), bias.reshape(1, c))
    # TODO(synk): for very large spatial extents also tile H with a halo
    #             (manual DMA); full-H blocks per (image, channel-tile) are
    #             fine at the resolutions exercised here.
    if s > 1:
        out1 = out1[:, ::s, ::s, :]
    return out1[:, :oh, :ow, :], oh, ow


def pool_se_gate(x, w1, b1, w2, b2):
    """Fused HW-mean + squeeze-excite gate: (N, HW, C) -> (N, C) f32 gate."""
    n, hw, c = x.shape
    cse = w1.shape[1]
    thw = hw if hw <= TILE_HW else TILE_HW
    return pl.pallas_call(
        functools.partial(_pool_gate_kernel, hw),
        out_shape=jax.ShapeDtypeStruct((n, c), jnp.float32),
        grid=(n, pl.cdiv(hw, thw)),
        in_specs=[
            pl.BlockSpec((None, thw, c), lambda ni, ti: (ni, ti, 0)),
            pl.BlockSpec((c, cse), lambda ni, ti: (0, 0)),
            pl.BlockSpec((1, cse), lambda ni, ti: (0, 0)),
            pl.BlockSpec((cse, c), lambda ni, ti: (0, 0)),
            pl.BlockSpec((1, c), lambda ni, ti: (0, 0)),
        ],
        out_specs=pl.BlockSpec((1, c), lambda ni, ti: (ni, 0)),
        scratch_shapes=[pltpu.VMEM((1, c), jnp.float32)],
        compiler_params=_compiler_params(("parallel", "arbitrary")),
    )(x, w1, b1.reshape(1, cse), w2, b2.reshape(1, c))


def pool_fc(x, w, b):
    """Fused global-average-pool + final Linear: (N, HW, C) -> (N, Cout) f32."""
    n, hw, c = x.shape
    cout = w.shape[1]
    thw = hw if hw <= TILE_HW else TILE_HW
    return pl.pallas_call(
        functools.partial(_pool_fc_kernel, hw),
        out_shape=jax.ShapeDtypeStruct((n, cout), jnp.float32),
        grid=(n, pl.cdiv(hw, thw)),
        in_specs=[
            pl.BlockSpec((None, thw, c), lambda ni, ti: (ni, ti, 0)),
            pl.BlockSpec((c, cout), lambda ni, ti: (0, 0)),
            pl.BlockSpec((1, cout), lambda ni, ti: (0, 0)),
        ],
        out_specs=pl.BlockSpec((1, cout), lambda ni, ti: (ni, 0)),
        scratch_shapes=[pltpu.VMEM((1, c), jnp.float32)],
        compiler_params=_compiler_params(("parallel", "arbitrary")),
    )(x, w, b.reshape(1, cout))


# ------------------------------ JAX glue ------------------------------------

def _same_pad(x, k, s):
    """TF-style SAME padding on NHWC input; returns padded x and output H/W."""
    _, h, w, _ = x.shape
    oh = -(-h // s)
    ow = -(-w // s)
    ph = max((oh - 1) * s + k - h, 0)
    pw = max((ow - 1) * s + k - w, 0)
    x = jnp.pad(x, ((0, 0), (ph // 2, ph - ph // 2), (pw // 2, pw - pw // 2), (0, 0)))
    return x, oh, ow


def _im2col(x, k, s):
    """kxk/stride-s patches (stem only; raw image has few channels)."""
    xp, oh, ow = _same_pad(x, k, s)
    cols = []
    for ki in range(k):
        for kj in range(k):
            cols.append(xp[:, ki:ki + s * (oh - 1) + 1:s, kj:kj + s * (ow - 1) + 1:s, :])
    return jnp.stack(cols, axis=3), oh, ow


def _mbconv(p, x):
    cfg = p["cfg"]
    n, h, w, cin = x.shape
    k, s, cout = cfg["k"], cfg["s"], cfg["cout"]

    # expand (1x1 conv + BN + swish), tiled over rows
    if "exp_w" in p:
        cexp = p["exp_w"].shape[1]
        hx = mm_bn_act(x.reshape(n * h * w, cin), p["exp_w"],
                       p["exp_s"], p["exp_b"]).reshape(n, h, w, cexp)
    else:
        hx = x
        cexp = cin

    # depthwise conv + BN + swish (window extraction fused in-kernel)
    dw, oh, ow = depthwise_bn_swish(hx, p["dw_w"], p["dw_s"], p["dw_b"], k, s)
    dw3 = dw.reshape(n, oh * ow, cexp)

    # squeeze-excite: fused pooled-mean + gate kernel; the gate is folded into
    # the project matmul below -> no gated copy of the expanded activation.
    gate = pool_se_gate(dw3, p["se_w1"], p["se_b1"], p["se_w2"], p["se_b2"])

    # project (1x1 conv + BN, no activation), residual fused when shapes allow
    residual = None
    if s == 1 and cin == cout:
        residual = x.reshape(n, h * w, cout)
    out = project_bn_gate(dw3, gate, p["proj_w"], p["proj_s"], p["proj_b"], residual)
    return out.reshape(n, oh, ow, cout)


def effnet_b3_forward(params, x_nchw):
    # PyTorch NCHW -> NHWC; bf16 activations, f32 accumulation inside kernels.
    x = jnp.transpose(x_nchw, (0, 2, 3, 1)).astype(jnp.bfloat16)
    n = x.shape[0]

    # stem: 3x3 stride-2 conv (im2col matmul) + BN + swish
    patches, oh, ow = _im2col(x, 3, 2)
    m = n * oh * ow
    feat = mm_bn_act(patches.reshape(m, -1), params["stem_w"],
                     params["stem_s"], params["stem_b"])
    feat = feat.reshape(n, oh, ow, STEM_OUT)

    # MBConv blocks
    for blk in params["blocks"]:
        feat = _mbconv(blk, feat)

    # head: 1x1 conv + BN + swish (Cout = 1536, already lane-dense)
    n, h, w, c = feat.shape
    head = mm_bn_act(feat.reshape(n * h * w, c), params["head_w"],
                     params["head_s"], params["head_b"])

    # fused global average pool + final Linear (dropout rate 0.0 -> identity);
    # FC output is lane-padded to 128 and sliced back to num_classes.
    logits = pool_fc(head.reshape(n, h * w, HEAD_OUT),
                     params["fc_w"], params["fc_b"])
    return logits[:, :params["num_classes"]]


# ------------------------------ parameters ----------------------------------

class _KeyGen:
    def __init__(self, key):
        self._key = key

    def __call__(self):
        self._key, sub = jax.random.split(self._key)
        return sub


def _conv_w(kg, shape, fan_in):
    return jax.random.normal(kg(), shape, jnp.float32) * (1.0 / math.sqrt(fan_in))


def _bn_fold(c):
    # gamma=1, beta=0, running_mean=0, running_var=1 (PyTorch defaults), folded.
    scale = jnp.full((c,), 1.0 / math.sqrt(1.0 + BN_EPS), jnp.float32)
    bias = jnp.zeros((c,), jnp.float32)
    return scale, bias


def _round_up(v, m):
    return -(-v // m) * m


def _maybe_pad_lanes(c, max_overhead=1.25):
    cp = _round_up(c, LANES)
    return cp if cp <= int(c * max_overhead) else c


def _pad_cols(a, c):
    return a if a.shape[1] == c else jnp.pad(a, ((0, 0), (0, c - a.shape[1])))


def _pad_rows(a, r):
    return a if a.shape[0] == r else jnp.pad(a, ((0, r - a.shape[0]), (0, 0)))


def _pad_vec(v, c):
    return v if v.shape[0] == c else jnp.pad(v, (0, c - v.shape[0]))


def init_params(key, in_channels, num_classes=9):
    kg = _KeyGen(key)
    params = {"num_classes": num_classes}

    # stem 3x3 conv (im2col layout: (k*k*Cin, Cout)); matmul weights in bf16
    params["stem_w"] = _conv_w(kg, (3 * 3 * in_channels, STEM_OUT),
                               3 * 3 * in_channels).astype(jnp.bfloat16)
    params["stem_s"], params["stem_b"] = _bn_fold(STEM_OUT)

    blocks = []
    for (k, s, e, cin, cout, reps) in STAGES:
        for i in range(reps):
            b_cin = cin if i == 0 else cout
            b_s = s if i == 0 else 1
            cexp = b_cin * e
            cse = max(1, int(b_cin * SE_RATIO))
            # Lane-dense padding of the expanded channel count (zero-filled
            # weights keep the math identical) when the overhead is small.
            cexp_p = _maybe_pad_lanes(cexp) if e != 1 else cexp
            blk = {"cfg": {"k": k, "s": b_s, "cout": cout}}
            if e != 1:
                blk["exp_w"] = _pad_cols(_conv_w(kg, (b_cin, cexp), b_cin),
                                         cexp_p).astype(jnp.bfloat16)
                es, eb = _bn_fold(cexp)
                blk["exp_s"], blk["exp_b"] = _pad_vec(es, cexp_p), _pad_vec(eb, cexp_p)
            blk["dw_w"] = _pad_cols(_conv_w(kg, (k * k, cexp), k * k), cexp_p)
            ds, db = _bn_fold(cexp)
            blk["dw_s"], blk["dw_b"] = _pad_vec(ds, cexp_p), _pad_vec(db, cexp_p)
            blk["se_w1"] = _pad_rows(_conv_w(kg, (cexp, cse), cexp), cexp_p)
            blk["se_b1"] = jnp.zeros((cse,), jnp.float32)
            blk["se_w2"] = _pad_cols(_conv_w(kg, (cse, cexp), cse), cexp_p)
            blk["se_b2"] = jnp.zeros((cexp_p,), jnp.float32)
            blk["proj_w"] = _pad_rows(_conv_w(kg, (cexp, cout), cexp),
                                      cexp_p).astype(jnp.bfloat16)
            blk["proj_s"], blk["proj_b"] = _bn_fold(cout)
            blocks.append(blk)
    params["blocks"] = blocks

    # head 1x1 conv
    params["head_w"] = _conv_w(kg, (384, HEAD_OUT), 384).astype(jnp.bfloat16)
    params["head_s"], params["head_b"] = _bn_fold(HEAD_OUT)

    # final Linear(1536 -> num_classes), output lane-padded to 128
    ncp = _round_up(num_classes, LANES)
    params["fc_w"] = _pad_cols(_conv_w(kg, (HEAD_OUT, num_classes), HEAD_OUT), ncp)
    params["fc_b"] = jnp.zeros((ncp,), jnp.float32)
    return params


# --------------------------------- main --------------------------------------

if __name__ == "__main__":
    key = jax.random.PRNGKey(0)
    k_params, k_x = jax.random.split(key)

    in_channels = 4
    num_classes = 9
    params = init_params(k_params, in_channels=in_channels, num_classes=num_classes)

    # PyTorch-style NCHW input, small synthetic shape.
    x = jax.random.normal(k_x, (2, in_channels, 16, 16), jnp.float32)

    logits = effnet_b3_forward(params, x)
    logits = jax.block_until_ready(logits)

    assert logits.shape == (2, num_classes), logits.shape
    assert bool(jnp.all(jnp.isfinite(logits)))
    print("KERNEL_OK")
</pallas_src>

<mosaic_0001>
module attributes {stable_mosaic.version = 11 : i64} {
  func.func @_mm_bn_act_kernel(%arg0: i32, %arg1: memref<128x36xbf16, #tpu.memory_space<vmem>>, %arg2: memref<36x40xbf16, #tpu.memory_space<vmem>>, %arg3: memref<1x40xf32, #tpu.memory_space<vmem>>, %arg4: memref<1x40xf32, #tpu.memory_space<vmem>>, %arg5: memref<128x40xbf16, #tpu.memory_space<vmem>>) attributes {dimension_semantics = [#tpu.dimension_semantics<parallel>], iteration_bounds = array<i64: 1>, scalar_prefetch = 0 : i64, scratch_operands = 0 : i64, tpu.core_type = #tpu.core_type<tc>, window_params = [{transform_indices = @transform_0, window_bounds = array<i64: 128, 36>}, {pipeline_mode = #tpu.pipeline_mode<synchronous>, transform_indices = @transform_1, window_bounds = array<i64: 36, 40>}, {pipeline_mode = #tpu.pipeline_mode<synchronous>, transform_indices = @transform_2, window_bounds = array<i64: 1, 40>}, {pipeline_mode = #tpu.pipeline_mode<synchronous>, transform_indices = @transform_3, window_bounds = array<i64: 1, 40>}, {transform_indices = @transform_4, window_bounds = array<i64: 128, 40>}]} {
    %c0 = arith.constant 0 : index
    %c0_0 = arith.constant 0 : index
    %0 = vector.load %arg1[%c0, %c0_0] : memref<128x36xbf16, #tpu.memory_space<vmem>>, vector<128x36xbf16>
    %c0_1 = arith.constant 0 : index
    %c0_2 = arith.constant 0 : index
    %1 = vector.load %arg2[%c0_1, %c0_2] : memref<36x40xbf16, #tpu.memory_space<vmem>>, vector<36x40xbf16>
    %cst = arith.constant dense<0.000000e+00> : vector<128x40xf32>
    %2 = tpu.matmul %0, %1, %cst {dimension_numbers = #tpu.dot_dimension_numbers<[1], [0], [0], [1], [0, 0, 1, 1], [], []>} : vector<128x36xbf16>, vector<36x40xbf16>, vector<128x40xf32> -> vector<128x40xf32>
    %c0_3 = arith.constant 0 : index
    %c0_4 = arith.constant 0 : index
    %3 = vector.load %arg3[%c0_3, %c0_4] : memref<1x40xf32, #tpu.memory_space<vmem>>, vector<1x40xf32>
    %4 = vector.broadcast %3 : vector<1x40xf32> to vector<128x40xf32>
    %5 = arith.mulf %2, %4 : vector<128x40xf32>
    %c0_5 = arith.constant 0 : index
    %c0_6 = arith.constant 0 : index
    %6 = vector.load %arg4[%c0_5, %c0_6] : memref<1x40xf32, #tpu.memory_space<vmem>>, vector<1x40xf32>
    %7 = vector.broadcast %6 : vector<1x40xf32> to vector<128x40xf32>
    %8 = arith.addf %5, %7 : vector<128x40xf32>
    %cst_7 = arith.constant 0.000000e+00 : f32
    %9 = vector.broadcast %cst_7 : f32 to vector<128x40xf32>
    %10 = arith.subf %9, %8 : vector<128x40xf32>
    %11 = math.exp %10 : vector<128x40xf32>
    %cst_8 = arith.constant 1.000000e+00 : f32
    %12 = vector.broadcast %cst_8 : f32 to vector<128x40xf32>
    %13 = arith.addf %12, %11 : vector<128x40xf32>
    %14 = tpu.reciprocal %13 {approx = true} : vector<128x40xf32> -> vector<128x40xf32>
    %15 = arith.mulf %8, %14 : vector<128x40xf32>
    %16 = arith.truncf %15 : vector<128x40xf32> to vector<128x40xbf16>
    %c0_9 = arith.constant 0 : index
    %c0_10 = arith.constant 0 : index
    %17 = vector.load %arg5[%c0_9, %c0_10] : memref<128x40xbf16, #tpu.memory_space<vmem>>, vector<128x40xbf16>
    tpu.vector_store %arg5[%c0_9, %c0_10], %16 {strides = array<i32>} : memref<128x40xbf16, #tpu.memory_space<vmem>>, vector<128x40xbf16>,
    return
  }
  func.func @transform_0(%arg0: i32) -> (i32, i32) {
    %c0_i32 = arith.constant 0 : i32
    %c0_i32_0 = arith.constant 0 : i32
    return %arg0, %c0_i32 : i32, i32
  }
  func.func @transform_1(%arg0: i32) -> (i32, i32) {
    %c0_i32 = arith.constant 0 : i32
    %c0_i32_0 = arith.constant 0 : i32
    %c0_i32_1 = arith.constant 0 : i32
    return %c0_i32, %c0_i32_0 : i32, i32
  }
  func.func @transform_2(%arg0: i32) -> (i32, i32) {
    %c0_i32 = arith.constant 0 : i32
    %c0_i32_0 = arith.constant 0 : i32
    %c0_i32_1 = arith.constant 0 : i32
    return %c0_i32, %c0_i32_0 : i32, i32
  }
  func.func @transform_3(%arg0: i32) -> (i32, i32) {
    %c0_i32 = arith.constant 0 : i32
    %c0_i32_0 = arith.constant 0 : i32
    %c0_i32_1 = arith.constant 0 : i32
    return %c0_i32, %c0_i32_0 : i32, i32
  }
  func.func @transform_4(%arg0: i32) -> (i32, i32) {
    %c0_i32 = arith.constant 0 : i32
    %c0_i32_0 = arith.constant 0 : i32
    return %arg0, %c0_i32 : i32, i32
  }
}

</mosaic_0001>

<bundles_post_ra>
// kernel: tpu_custom_call.1
= control target key start
LH: loop header
LB: loop body
LE: loop exit
PB: predicated region body
PF: predicated region fallthrough
CT: control target
= control target key end

     0   :  { %vm119_vm0 = vcmask 1041408   ;;  %vm94_vm1 = vcmask 293888   ;;  %vm426_vm2 = vcmask 322560   ;;  %s852_s1 = inlined_call_operand.vmem [shape: bf16[36,40], index: 1, kind: input, shape index: {}]   ;;  %s853_s0 = inlined_call_operand.vmem [shape: bf16[128,36], index: 0, kind: input, shape index: {}]   ;;  %s854_s2 = inlined_call_operand.vmem [shape: f32[1,40], index: 2, kind: input, shape index: {}]   ;;  %s855_s3 = inlined_call_operand.vmem [shape: f32[1,40], index: 3, kind: input, shape index: {}]   ;;  %s856_s4 = inlined_call_operand.vmem [shape: bf16[128,40], index: 4, kind: output, shape index: {}]  }
   0x1   :  { %v541_v0 = vld [vmem:[%s852_s1 + $0x10] ss:$0 sps:$4 sm:$0x33]   ;;  %v542_v1 = vld [vmem:[%s852_s1 + $0x8] sm:$0xff]   ;;  %v543_v3 = vld [vmem:[%s852_s1] sm:$0xff]  }
   0x2   :  { %539 = vmatprep.subr.msk.bf16.mxu0 %vm119_vm0, %v541_v0  ;;  %540 = vmatprep.subr.msk.bf16.mxu1 %vm119_vm0, %v541_v0  ;;  %v121_v2 = vsel %vm119_vm0, %v541_v0, 0  ;;  %v544_v4 = vld [vmem:[%s853_s0] sm:$0xff]   ;;  %v546_v6 = vld [vmem:[%s853_s0 + $0x8] sm:$0xff]   ;;  %v548_v8 = vld [vmem:[%s853_s0 + $0x10] sm:$0xff]  }
   0x3   :  { %512 = vmatpush3.bf16.msra.mxu0 %v121_v2  ;;  %536 = vmatpush3.bf16.msra.mxu1 %v121_v2  ;;  %v545_v5 = vld [vmem:[%s853_s0 + $0x20] sm:$0xff]   ;;  %v547_v7 = vld [vmem:[%s853_s0 + $0x28] sm:$0xff]   ;;  %v549_v9 = vld [vmem:[%s853_s0 + $0x30] sm:$0xff]  }
   0x4   :  { %513 = vmatprep.subr.bf16.mxu0 %v542_v1  ;;  %534 = vmatprep.subr.bf16.mxu1 %v542_v1  ;;  %v550_v10 = vld [vmem:[%s853_s0 + $0x18] sm:$0xff]   ;;  %v685_v12 = vld [vmem:[%s854_s2] ss:$0 sm:$0xff] }
   0x5   :  { %517 = vmatprep.mubr.msk.bf16.mxu0 %vm94_vm1, %v544_v4  ;;  %525 = vmatprep.mubr.msk.bf16.mxu1 %vm94_vm1, %v545_v5  ;;  %v551_v11 = vld [vmem:[%s853_s0 + $0x38] sm:$0xff]   ;;  %v690_v14 = vld [vmem:[%s855_s3] ss:$0 sm:$0xff] }
   0x7   :  { %514 = vmatpush3.bf16.msra.mxu0 %v542_v1  ;;  %537 = vmatpush3.bf16.msra.mxu1 %v542_v1 }
   0x8   :  { %515 = vmatprep.subr.bf16.mxu0 %v543_v3  ;;  %535 = vmatprep.subr.bf16.mxu1 %v543_v3 }
   0xb   :  { %516 = vmatpush3.bf16.msra.mxu0 %v543_v3  ;;  %538 = vmatpush3.bf16.msra.mxu1 %v543_v3 }
   0xe   :  { %518 = vmatmul.mubr.msk.bf16.vlgmr.msra.gmra.mxu0 %vm94_vm1, %v546_v6  ;;  %526 = vmatmul.mubr.msk.bf16.vlgmr.msra.gmra.mxu1 %vm94_vm1, %v547_v7 }
   0xf   :  { %521 = vmatprep.mubr.msk.bf16.mxu0 %vm94_vm1, %v548_v8  ;;  %529 = vmatprep.mubr.msk.bf16.mxu1 %vm94_vm1, %v549_v9 }
  0x16   :  { %522 = vmatmul.mubr.msk.bf16.gmra.mxu0 %vm94_vm1, %v550_v10  ;;  %530 = vmatmul.mubr.msk.bf16.gmra.mxu1 %vm94_vm1, %v551_v11 }
  0xce   :  { %v519_v13 = vpop.f32.mrf.mxu0  ;;  %v527_v15 = vpop.f32.mrf.mxu1 }
  0xcf   :  { %v229_v16 = vmul.f32 %v519_v13, %v685_v12  ;;  %v237_v17 = vmul.f32 %v527_v15, %v685_v12 }
  0xd0   :  { %v157_v18 = vpop.f32.mrf.mxu0  ;;  %v189_v19 = vpop.f32.mrf.mxu1 }
  0xd1   :  { %v695_v20 = vadd.f32 %v690_v14, %v229_v16  ;;  %v698_v21 = vadd.f32 %v690_v14, %v237_v17  ;;  %v227_v22 = vmul.f32 %v685_v12, %v157_v18  ;;  %v235_v23 = vmul.f32 %v685_v12, %v189_v19 }
  0xd2   :  { %v520_v24 = vpop.f32.mrf.mxu0  ;;  %v528_v25 = vpop.f32.mrf.mxu1 }
  0xd3   :  { %v268_v26 = vsub.f32 0.0, %v695_v20  ;;  %v276_v27 = vsub.f32 0.0, %v698_v21  ;;  %v705_v28 = vadd.f32 %v690_v14, %v227_v22  ;;  %v708_v29 = vadd.f32 %v690_v14, %v235_v23 }
  0xd4   :  { %v230_v30 = vmul.f32 %v520_v24, %v685_v12  ;;  %v238_v31 = vmul.f32 %v528_v25, %v685_v12  ;;  %v160_v32 = vpop.f32.mrf.mxu0  ;;  %v192_v33 = vpop.f32.mrf.mxu1 }
  0xd5   :  { %v286_v34 = vmul.f32 1.442695, %v268_v26  ;;  %v302_v35 = vmul.f32 1.442695, %v276_v27  ;;  %v266_v36 = vsub.f32 0.0, %v705_v28  ;;  %v274_v37 = vsub.f32 0.0, %v708_v29 }
  0xd6   :  { %v715_v38 = vadd.f32 %v690_v14, %v230_v30  ;;  %v718_v39 = vadd.f32 %v690_v14, %v238_v31  ;;  %v228_v40 = vmul.f32 %v685_v12, %v160_v32  ;;  %v236_v41 = vmul.f32 %v685_v12, %v192_v33  ;;  %v523_v42 = vpop.f32.mrf.mxu0  ;;  %v531_v43 = vpop.f32.mrf.mxu1 }
  0xd7   :  { %552 = vpow2.f32 %v286_v34  ;;  %v282_v44 = vmul.f32 1.442695, %v266_v36  ;;  %v298_v45 = vmul.f32 1.442695, %v274_v37  ;;  %v233_v46 = vmul.f32 %v523_v42, %v685_v12 }
  0xd8   :  { %554 = vpow2.f32 %v302_v35  ;;  %v269_v47 = vsub.f32 0.0, %v715_v38  ;;  %v277_v48 = vsub.f32 0.0, %v718_v39  ;;  %v726_v49 = vadd.f32 %v690_v14, %v228_v40  ;;  %v173_v50 = vpop.f32.mrf.mxu0  ;;  %v205_v51 = vpop.f32.mrf.mxu1 }
  0xd9   :  { %556 = vpow2.f32 %v282_v44  ;;  %v729_v52 = vadd.f32 %v690_v14, %v236_v41  ;;  %v732_v53 = vadd.f32 %v690_v14, %v233_v46  ;;  %v241_v54 = vmul.f32 %v531_v43, %v685_v12 }
  0xda   :  { %558 = vpow2.f32 %v298_v45  ;;  %v288_v55 = vmul.f32 1.442695, %v269_v47  ;;  %v304_v56 = vmul.f32 1.442695, %v277_v48  ;;  %v267_v57 = vsub.f32 0.0, %v726_v49  ;;  %v524_v58 = vpop.f32.mrf.mxu0  ;;  %v532_v2 = vpop.f32.mrf.mxu1 }
  0xdb   :  { %v275_v59 = vsub.f32 0.0, %v729_v52  ;;  %v272_v60 = vsub.f32 0.0, %v732_v53  ;;  %v739_v61 = vadd.f32 %v690_v14, %v241_v54  ;;  %v231_v62 = vmul.f32 %v685_v12, %v173_v50 }
  0xdc   :  { %560 = vpow2.f32 %v288_v55  ;;  %v284_v63 = vmul.f32 1.442695, %v267_v57  ;;  %v239_v0 = vmul.f32 %v685_v12, %v205_v51  ;;  %v234_v1 = vmul.f32 %v524_v58, %v685_v12  ;;  %v176_v11 = vpop.f32.mrf.mxu0  ;;  %v208_v17 = vpop.f32.mrf.mxu1 }
  0xdd   :  { %562 = vpow2.f32 %v304_v56  ;;  %v300_v3 = vmul.f32 1.442695, %v275_v59  ;;  %v294_v4 = vmul.f32 1.442695, %v272_v60  ;;  %v280_v5 = vsub.f32 0.0, %v739_v61 }
  0xde   :  { %564 = vpow2.f32 %v284_v63  ;;  %v746_v6 = vadd.f32 %v690_v14, %v231_v62  ;;  %v749_v7 = vadd.f32 %v690_v14, %v239_v0  ;;  %v752_v8 = vadd.f32 %v690_v14, %v234_v1 }
  0xdf   :  { %566 = vpow2.f32 %v300_v3  ;;  %v310_v9 = vmul.f32 1.442695, %v280_v5  ;;  %v242_v10 = vmul.f32 %v532_v2, %v685_v12  ;;  %v232_v24 = vmul.f32 %v685_v12, %v176_v11 }
  0xe0   :  { %568 = vpow2.f32 %v294_v4  ;;  %v270_v13 = vsub.f32 0.0, %v746_v6  ;;  %v278_v15 = vsub.f32 0.0, %v749_v7  ;;  %v273_v16 = vsub.f32 0.0, %v752_v8 }
  0xe1   :  { %570 = vpow2.f32 %v310_v9  ;;  %v759_v18 = vadd.f32 %v690_v14, %v242_v10  ;;  %v240_v26 = vmul.f32 %v685_v12, %v208_v17  ;;  %v765_v34 = vadd.f32 %v690_v14, %v232_v24 }
  0xe2   :  { %v290_v19 = vmul.f32 1.442695, %v270_v13  ;;  %v306_v22 = vmul.f32 1.442695, %v278_v15  ;;  %v296_v23 = vmul.f32 1.442695, %v273_v16 }
  0xe3   :  { %v281_v25 = vsub.f32 0.0, %v759_v18  ;;  %v768_v40 = vadd.f32 %v690_v14, %v240_v26  ;;  %v271_v44 = vsub.f32 0.0, %v765_v34 }
  0xe4   :  { %v553_v27 = vpop.eup %552  ;;  %572 = vpow2.f32 %v290_v19 }
  0xe5   :  { %v555_v30 = vpop.eup %554  ;;  %v316_v31 = vadd.f32 1.0, %v553_v27  ;;  %574 = vpow2.f32 %v306_v22  ;;  %v312_v37 = vmul.f32 1.442695, %v281_v25  ;;  %v279_v47 = vsub.f32 0.0, %v768_v40 }
  0xe6   :  { %v557_v32 = vpop.eup %556  ;;  %v324_v33 = vadd.f32 1.0, %v555_v30  ;;  %576 = vpow2.f32 %v296_v23  ;;  %v292_v56 = vmul.f32 1.442695, %v271_v44 }
  0xe7   :  { %v559_v35 = vpop.eup %558  ;;  %578 = vrcp.f32 %v316_v31  ;;  %v314_v36 = vadd.f32 1.0, %v557_v32  ;;  %v308_v58 = vmul.f32 1.442695, %v279_v47 }
  0xe8   :  { %580 = vrcp.f32 %v324_v33  ;;  %v322_v12 = vadd.f32 1.0, %v559_v35 }
  0xe9   :  { %v561_v41 = vpop.eup %560  ;;  %582 = vrcp.f32 %v314_v36 }
  0xea   :  { %v563_v42 = vpop.eup %562  ;;  %584 = vrcp.f32 %v322_v12  ;;  %v317_v43 = vadd.f32 1.0, %v561_v41 }
  0xeb   :  { %v565_v45 = vpop.eup %564  ;;  %v325_v46 = vadd.f32 1.0, %v563_v42  ;;  %586 = vpow2.f32 %v312_v37 }
  0xec   :  { %v567_v48 = vpop.eup %566  ;;  %588 = vrcp.f32 %v317_v43  ;;  %v315_v50 = vadd.f32 1.0, %v565_v45 }
  0xed   :  { %v569_v51 = vpop.eup %568  ;;  %590 = vrcp.f32 %v325_v46  ;;  %v323_v14 = vadd.f32 1.0, %v567_v48 }
  0xee   :  { %v571_v54 = vpop.eup %570  ;;  %592 = vrcp.f32 %v315_v50  ;;  %v320_v55 = vadd.f32 1.0, %v569_v51 }
  0xef   :  { %594 = vrcp.f32 %v323_v14  ;;  %v328_v57 = vadd.f32 1.0, %v571_v54 }
  0xf0   :  { %596 = vrcp.f32 %v320_v55 }
  0xf1   :  { %v573_v59 = vpop.eup %572  ;;  %598 = vrcp.f32 %v328_v57 }
  0xf2   :  { %v575_v60 = vpop.eup %574  ;;  %v318_v62 = vadd.f32 1.0, %v573_v59  ;;  %600 = vpow2.f32 %v292_v56 }
  0xf3   :  { %v577_v63 = vpop.eup %576  ;;  %v326_v0 = vadd.f32 1.0, %v575_v60  ;;  %602 = vpow2.f32 %v308_v58 }
  0xf4   :  { %v579_v1 = vpop.eup %578  ;;  %604 = vrcp.f32 %v318_v62  ;;  %v321_v2 = vadd.f32 1.0, %v577_v63 }
  0xf5   :  { %v581_v3 = vpop.eup %580  ;;  %v348_v4 = vmul.f32 %v579_v1, %v695_v20  ;;  %606 = vrcp.f32 %v326_v0 }
  0xf6   :  { %v583_v5 = vpop.eup %582  ;;  %v356_v9 = vmul.f32 %v581_v3, %v698_v21  ;;  %608 = vrcp.f32 %v321_v2 }
  0xf7   :  { %v585_v10 = vpop.eup %584  ;;  %v486_v11 = vpack.c.bf16 %v348_v4, %v348_v4  ;;  %v346_v13 = vmul.f32 %v583_v5, %v705_v28 }
  0xf8   :  { %v587_v15 = vpop.eup %586  ;;  %v494_v16 = vpack.c.bf16 %v356_v9, %v356_v9  ;;  %v354_v17 = vmul.f32 %v585_v10, %v708_v29 }
  0xf9   :  { %v589_v19 = vpop.eup %588  ;;  %429 = vst.msk [vmem:[%s856_s4 + $0x8] sm:$0xf] %vm426_vm2, %v486_v11  ;;  %v484_v20 = vpack.c.bf16 %v346_v13, %v346_v13  ;;  %v329_v22 = vadd.f32 1.0, %v587_v15 }
  0xfa   :  { %v591_v23 = vpop.eup %590  ;;  %437 = vst.msk [vmem:[%s856_s4 + $0x28] sm:$0xf] %vm426_vm2, %v494_v16  ;;  %v492_v21 = vpack.c.bf16 %v354_v17, %v354_v17  ;;  %v349_v28 = vmul.f32 %v589_v19, %v715_v38 }
  0xfb   :  { %v593_v24 = vpop.eup %592  ;;  %427 = vst.msk [vmem:[%s856_s4] sm:$0xf] %vm426_vm2, %v484_v20  ;;  %v357_v29 = vmul.f32 %v591_v23, %v718_v39  ;;  %610 = vrcp.f32 %v329_v22 }
  0xfc   :  { %v595_v25 = vpop.eup %594  ;;  %435 = vst.msk [vmem:[%s856_s4 + $0x20] sm:$0xf] %vm426_vm2, %v492_v21  ;;  %v487_v26 = vpack.c.bf16 %v349_v28, %v349_v28  ;;  %v347_v27 = vmul.f32 %v593_v24, %v726_v49 }
  0xfd   :  { %v597_v30 = vpop.eup %596  ;;  %v495_v38 = vpack.c.bf16 %v357_v29, %v357_v29  ;;  %v355_v31 = vmul.f32 %v595_v25, %v729_v52 }
  0xfe   :  { %v599_v32 = vpop.eup %598  ;;  %430 = vst.msk [vmem:[%s856_s4 + $0xc] sm:$0xf] %vm426_vm2, %v487_v26  ;;  %v485_v39 = vpack.c.bf16 %v347_v27, %v347_v27  ;;  %v352_v33 = vmul.f32 %v597_v30, %v732_v53 }
  0xff   :  { %v601_v35 = vpop.eup %600  ;;  %438 = vst.msk [vmem:[%s856_s4 + $0x2c] sm:$0xf] %vm426_vm2, %v495_v38  ;;  %v493_v49 = vpack.c.bf16 %v355_v31, %v355_v31  ;;  %v360_v36 = vmul.f32 %v599_v32, %v739_v61 }
 0x100   :  { %v603_v37 = vpop.eup %602  ;;  %428 = vst.msk [vmem:[%s856_s4 + $0x4] sm:$0xf] %vm426_vm2, %v485_v39  ;;  %v490_v52 = vpack.c.bf16 %v352_v33, %v352_v33  ;;  %v319_v12 = vadd.f32 1.0, %v601_v35 }
 0x101   :  { %v605_v41 = vpop.eup %604  ;;  %436 = vst.msk [vmem:[%s856_s4 + $0x24] sm:$0xf] %vm426_vm2, %v493_v49  ;;  %v498_v53 = vpack.c.bf16 %v360_v36, %v360_v36  ;;  %v327_v42 = vadd.f32 1.0, %v603_v37 }
 0x102   :  { %v607_v43 = vpop.eup %606  ;;  %433 = vst.msk [vmem:[%s856_s4 + $0x18] sm:$0xf] %vm426_vm2, %v490_v52  ;;  %v350_v61 = vmul.f32 %v605_v41, %v746_v6  ;;  %612 = vrcp.f32 %v319_v12 }
 0x103   :  { %v609_v44 = vpop.eup %608  ;;  %441 = vst.msk [vmem:[%s856_s4 + $0x38] sm:$0xf] %vm426_vm2, %v498_v53  ;;  %v358_v45 = vmul.f32 %v607_v43, %v749_v7  ;;  %614 = vrcp.f32 %v327_v42 }
 0x104   :  { %v488_v46 = vpack.c.bf16 %v350_v61, %v350_v61  ;;  %v353_v47 = vmul.f32 %v609_v44, %v752_v8 }
 0x105   :  { %v496_v48 = vpack.c.bf16 %v358_v45, %v358_v45 }
 0x106   :  { %431 = vst.msk [vmem:[%s856_s4 + $0x10] sm:$0xf] %vm426_vm2, %v488_v46  ;;  %v491_v6 = vpack.c.bf16 %v353_v47, %v353_v47 }
 0x107   :  { %439 = vst.msk [vmem:[%s856_s4 + $0x30] sm:$0xf] %vm426_vm2, %v496_v48 }
 0x108   :  { %v611_v50 = vpop.eup %610  ;;  %434 = vst.msk [vmem:[%s856_s4 + $0x1c] sm:$0xf] %vm426_vm2, %v491_v6 }
 0x109   :  { %v361_v7 = vmul.f32 %v611_v50, %v759_v18 }
 0x10b   :  { %v499_v8 = vpack.c.bf16 %v361_v7, %v361_v7 }
 0x10d   :  { %442 = vst.msk [vmem:[%s856_s4 + $0x3c] sm:$0xf] %vm426_vm2, %v499_v8 }
 0x10f   :  { %v613_v51 = vpop.eup %612 }
 0x110   :  { %v615_v14 = vpop.eup %614  ;;  %v351_v54 = vmul.f32 %v613_v51, %v765_v34 }
 0x111   :  { %v359_v55 = vmul.f32 %v615_v14, %v768_v40 }
 0x112   :  { %v489_v56 = vpack.c.bf16 %v351_v54, %v351_v54 }
 0x113   :  { %v497_v57 = vpack.c.bf16 %v359_v55, %v359_v55 }
 0x114   :  { %432 = vst.msk [vmem:[%s856_s4 + $0x14] sm:$0xf] %vm426_vm2, %v489_v56 }
 0x115   :  { %440 = vst.msk [vmem:[%s856_s4 + $0x34] sm:$0xf] %vm426_vm2, %v497_v57 }

</bundles_post_ra>
